<compile_context>
chip_gen: v6e
topology: v6e:2x2x1
jax: 0.10.0
libtpu: 0.0.40
codegen_flags: <defaults>
</compile_context>

<pallas_src>
import numpy as np
import jax
import jax.numpy as jnp
from jax.experimental import pallas as pl
from jax.experimental.pallas import tpu as pltpu


def _round_up(v, m):
    return ((v + m - 1) // m) * m


def _largest_tile(total, unit, cap):
    """Largest multiple of `unit`, <= cap, that divides `total` (total % unit == 0)."""
    d = max(unit, min(total, (cap // unit) * unit))
    while total % d != 0:
        d -= unit
    return d


def _pick_tiles(n_src_pad, n_dst_pad, max_path_len, budget_bytes=6 * 1024 * 1024):
    """Pick (tm, td).  The dominant per-block VMEM cost is the double-buffered
    [L, tm, td] f32 hop_scores block; keep 2 * that under `budget_bytes` so the
    whole pipeline (plus counts + output blocks) fits the smallest scoped VMEM
    default across generations (16 MiB on v5e)."""
    td = _largest_tile(n_dst_pad, 128, 512)            # lane-dense, >=128 wide stores
    per_row = max_path_len * td * 4                     # f32 bytes per src row per buffer
    cap_rows = max(8, (budget_bytes // (2 * per_row)) // 8 * 8)
    tm = _largest_tile(n_src_pad, 8, min(cap_rows, 256))
    # Guarantee >= 2 grid iterations when possible so v7x's two TensorCores
    # both get work (no effect on v5e/v6e single-TC parts).
    if (n_src_pad // tm) * (n_dst_pad // td) < 2 and tm >= 16 and tm % 16 == 0:
        tm //= 2
    return tm, td


def edge_encoding_kernel(hop_scores_ref, counts_ref, cij_ref):
    # hop_scores_ref: [L, TM, TD] f32  (0 where the hop is absent / padded)
    # counts_ref    : [TM, TD]    f32  (path lengths; 0 for missing paths)
    # cij_ref       : [TM, TD]    f32
    sums = jnp.sum(hop_scores_ref[...], axis=0)          # L elementwise adds on the VPU
    counts = counts_ref[...]

    # Mean with the divide on the EUP slot; one Newton step restores ~f32 accuracy.
    denom = jnp.maximum(counts, 1.0)
    inv = pl.reciprocal(denom, approx=True)
    inv = inv * (2.0 - denom * inv)
    cij_ref[...] = jnp.where(counts > 0.0, sums * inv, 0.0)   # torch.nan_to_num


def edge_paths_to_dense(edge_paths, n_src, n_dst, max_len, num_edges):
    """Host-side glue: dict-of-dicts paths -> padded [L, n_src, n_dst] int32 (-1 pad)."""
    dense = np.full((max_len, n_src, n_dst), -1, dtype=np.int32)
    for src in edge_paths:
        for dst in edge_paths[src]:
            path = list(edge_paths[src][dst])[:max_len]
            for hop, eid in enumerate(path):
                assert 0 <= eid < num_edges, "edge id out of range in edge_paths"
                dense[hop, src, dst] = eid
    return dense


def edge_encoding(x, edge_attr, edge_paths, w, max_path_len=None):
    """Forward pass of graphormer EdgeEncoding.  w is the nn.Linear weight, [1, edge_dim]."""
    n = x.shape[0]
    num_edges, edge_dim = edge_attr.shape

    if max_path_len is None:
        max_path_len = max(
            (len(edge_paths[s][d]) for s in edge_paths for d in edge_paths[s]), default=1)
    max_path_len = max(1, int(max_path_len))

    # Padded, lane-friendly layouts (wrapper-side plumbing only).
    n_src_pad = _round_up(max(n, 8), 8)        # sublane axis of the output tile
    n_dst_pad = _round_up(max(n, 128), 128)    # lane axis: unmasked stores

    # TODO(synk): the dict-of-dicts edge_paths densification stays host-side numpy;
    # there is no Pallas equivalent for building that ragged structure on-device.
    path_idx = jnp.asarray(
        edge_paths_to_dense(edge_paths, n_src_pad, n_dst_pad, max_path_len, num_edges))
    edge_attr_d = jnp.asarray(edge_attr, jnp.float32)
    w_row = jnp.asarray(w, jnp.float32).reshape(1, edge_dim)

    tm, td = _pick_tiles(n_src_pad, n_dst_pad, max_path_len)
    grid = (n_src_pad // tm, n_dst_pad // td)

    @jax.jit
    def run(edge_attr_d, w_row, path_idx):
        # Tiny projection + gather hoisted out of the kernel (review option (a)):
        # the kernel then streams only the [L, N, N] hop scores (mem-bound).
        scores = (edge_attr_d @ w_row.T)[:, 0]                       # [E]
        valid = path_idx >= 0                                        # [L, Ns, Nd]
        hop_scores = jnp.where(
            valid, jnp.take(scores, jnp.maximum(path_idx, 0), axis=0), 0.0
        ).astype(jnp.float32)                                        # [L, Ns, Nd]
        counts = valid.sum(axis=0).astype(jnp.float32)               # [Ns, Nd]

        return pl.pallas_call(
            edge_encoding_kernel,
            out_shape=jax.ShapeDtypeStruct((n_src_pad, n_dst_pad), jnp.float32),
            grid=grid,
            in_specs=[
                pl.BlockSpec((max_path_len, tm, td), lambda i, j: (0, i, j)),
                pl.BlockSpec((tm, td), lambda i, j: (i, j)),
            ],
            out_specs=pl.BlockSpec((tm, td), lambda i, j: (i, j)),
            compiler_params=pltpu.CompilerParams(
                dimension_semantics=("parallel", "parallel"),
                vmem_limit_bytes=32 * 1024 * 1024,
            ),
        )(hop_scores, counts)

    cij_padded = run(edge_attr_d, w_row, path_idx)
    return cij_padded[:n, :n]


def reference_numpy(x, edge_attr, edge_paths, w):
    """Pure-numpy replica of the PyTorch forward for correctness checking."""
    n = x.shape[0]
    scores = np.asarray(edge_attr, np.float32) @ np.asarray(w, np.float32).T  # [E, 1]
    cij = np.zeros((n, n), np.float32)
    for src in edge_paths:
        for dst in edge_paths[src]:
            p = list(edge_paths[src][dst])
            if len(p) > 0:
                cij[src, dst] = scores[np.asarray(p)].mean()
            # empty / missing paths stay 0 (nan -> nan_to_num -> 0)
    return cij


if __name__ == "__main__":
    # small, deterministic shapes
    N = 8          # number of nodes
    node_dim = 16  # node feature dim (only N is actually used by the module)
    edge_dim = 8   # edge feature dim
    E = 16         # number of edges
    L = 4          # max path length used to generate edge_paths

    key = jax.random.PRNGKey(0)
    k1, k2, k3, k4, k5 = jax.random.split(key, 5)

    x = jax.random.normal(k1, (N, node_dim), jnp.float32)
    edge_attr = jax.random.normal(k2, (E, edge_dim), jnp.float32)
    # nn.Linear(edge_dim, 1, bias=False) weight, torch layout [1, edge_dim]
    w = (jax.random.normal(k3, (1, edge_dim), jnp.float32) / np.sqrt(edge_dim)).astype(jnp.float32)

    # deterministic synthetic edge_paths: dict {src: {dst: [edge indices]}}
    path_lens = np.asarray(jax.random.randint(k4, (N, N), 0, L + 1))
    path_edges = np.asarray(jax.random.randint(k5, (N, N, L), 0, E))
    edge_paths = {}
    for s in range(N):
        edge_paths[s] = {}
        for d in range(N):
            if s == d:
                continue
            ln = int(path_lens[s, d])
            if ln > 0:
                edge_paths[s][d] = [int(e) for e in path_edges[s, d, :ln]]

    out = edge_encoding(x, edge_attr, edge_paths, w)
    out = jax.block_until_ready(out)

    ref = reference_numpy(x, edge_attr, edge_paths, w)
    # Tolerance accommodates the approximate EUP reciprocal (refined by one Newton step).
    np.testing.assert_allclose(np.asarray(out), ref, rtol=1e-4, atol=1e-4)
    print("KERNEL_OK")
</pallas_src>

<mosaic_0001>
module attributes {stable_mosaic.version = 11 : i64} {
  func.func @edge_encoding_kernel(%arg0: i32, %arg1: i32, %arg2: memref<4x8x128xf32, #tpu.memory_space<vmem>>, %arg3: memref<8x128xf32, #tpu.memory_space<vmem>>, %arg4: memref<8x128xf32, #tpu.memory_space<vmem>>) attributes {dimension_semantics = [#tpu.dimension_semantics<parallel>, #tpu.dimension_semantics<parallel>], iteration_bounds = array<i64: 1, 1>, scalar_prefetch = 0 : i64, scratch_operands = 0 : i64, tpu.core_type = #tpu.core_type<tc>, window_params = [{transform_indices = @transform_0, window_bounds = array<i64: 4, 8, 128>}, {transform_indices = @transform_1, window_bounds = array<i64: 8, 128>}, {transform_indices = @transform_2, window_bounds = array<i64: 8, 128>}]} {
    %c0 = arith.constant 0 : index
    %c0_0 = arith.constant 0 : index
    %c0_1 = arith.constant 0 : index
    %0 = vector.load %arg2[%c0, %c0_0, %c0_1] : memref<4x8x128xf32, #tpu.memory_space<vmem>>, vector<4x8x128xf32>
    %cst = arith.constant dense<0.000000e+00> : vector<8x128xf32>
    %1 = vector.multi_reduction <add>, %0, %cst [0] : vector<4x8x128xf32> to vector<8x128xf32>
    %c0_2 = arith.constant 0 : index
    %c0_3 = arith.constant 0 : index
    %2 = vector.load %arg3[%c0_2, %c0_3] : memref<8x128xf32, #tpu.memory_space<vmem>>, vector<8x128xf32>
    %cst_4 = arith.constant 1.000000e+00 : f32
    %3 = vector.broadcast %cst_4 : f32 to vector<8x128xf32>
    %4 = arith.maximumf %2, %3 : vector<8x128xf32>
    %5 = tpu.reciprocal %4 {approx = true} : vector<8x128xf32> -> vector<8x128xf32>
    %6 = arith.mulf %4, %5 : vector<8x128xf32>
    %cst_5 = arith.constant 2.000000e+00 : f32
    %7 = vector.broadcast %cst_5 : f32 to vector<8x128xf32>
    %8 = arith.subf %7, %6 : vector<8x128xf32>
    %9 = arith.mulf %5, %8 : vector<8x128xf32>
    %cst_6 = arith.constant 0.000000e+00 : f32
    %10 = vector.broadcast %cst_6 : f32 to vector<8x128xf32>
    %11 = arith.cmpf ogt, %2, %10 : vector<8x128xf32>
    %12 = arith.mulf %1, %9 : vector<8x128xf32>
    %cst_7 = arith.constant 0.000000e+00 : f32
    %13 = vector.broadcast %cst_7 : f32 to vector<8x128xf32>
    %14 = arith.select %11, %12, %13 : vector<8x128xi1>, vector<8x128xf32>
    %c0_8 = arith.constant 0 : index
    %c0_9 = arith.constant 0 : index
    %15 = vector.load %arg4[%c0_8, %c0_9] : memref<8x128xf32, #tpu.memory_space<vmem>>, vector<8x128xf32>
    tpu.vector_store %arg4[%c0_8, %c0_9], %14 {strides = array<i32>} : memref<8x128xf32, #tpu.memory_space<vmem>>, vector<8x128xf32>,
    return
  }
  func.func @transform_0(%arg0: i32, %arg1: i32) -> (i32, i32, i32) {
    %c0_i32 = arith.constant 0 : i32
    %c0_i32_0 = arith.constant 0 : i32
    return %c0_i32, %arg0, %arg1 : i32, i32, i32
  }
  func.func @transform_1(%arg0: i32, %arg1: i32) -> (i32, i32) {
    %c0_i32 = arith.constant 0 : i32
    return %arg0, %arg1 : i32, i32
  }
  func.func @transform_2(%arg0: i32, %arg1: i32) -> (i32, i32) {
    %c0_i32 = arith.constant 0 : i32
    return %arg0, %arg1 : i32, i32
  }
}

</mosaic_0001>

<bundles_post_ra>
// kernel: run.1
= control target key start
LH: loop header
LB: loop body
LE: loop exit
PB: predicated region body
PF: predicated region fallthrough
CT: control target
= control target key end

     0   :  { %s102_s0 = inlined_call_operand.vmem [shape: f32[4,8,128], index: 0, kind: input, shape index: {}]   ;;  %s103_s1 = inlined_call_operand.vmem [shape: f32[8,128], index: 1, kind: input, shape index: {}]   ;;  %s104_s2 = inlined_call_operand.hbm [shape: f32[8,128], index: 2, kind: output, shape index: {}]  }
   0x1   :  { %v19_v0 = vld [vmem:[%s103_s1] sm:$0xff] }
   0x2   :  { %7 = vsyncpa [#allocation3], 0  ;;  %v20_v1 = vmax.f32 %v19_v0, 1.0  ;;  %v12_v2 = vld [vmem:[%s102_s0] sm:$0xff]  ;;  %v13_v3 = vld [vmem:[%s102_s0 + $0x8] sm:$0xff]  ;;  %s68_s18 = smov [#allocation2]  }
   0x3   :  { %v16_v4 = vadd.f32 %v13_v3, %v12_v2  ;;  %v14_v5 = vld [vmem:[%s102_s0 + $0x10] sm:$0xff]  ;;  %v15_v8 = vld [vmem:[%s102_s0 + $0x18] sm:$0xff]  ;;  %s35_s19 = sshll.u32 %s68_s18, 4  ;;  %vm25_vm0 = vcmp.gt.f32.partialorder %v19_v0, 0.0  ;;  %s36_s19 = int_to_ptr.vmem [resolvable:$true] %s35_s19 }
   0x4   :  { %44 = vrcp.f32 %v20_v1  ;;  %s46_s20 = scalar_lea.vmem %s36_s19, 128  ;;  %p51_p1 = scmp.lt.s32.totalorder %s36_s19, %s36_s19 }
   0x5   :  { %v17_v6 = vadd.f32 %v16_v4, %v14_v5  ;;  %p47_p0 = scmp.ne.s32.totalorder %s36_s19, %s46_s20  ;;  %p52_p2 = scmp.lt.s32.totalorder %s46_s20, %s46_s20 }
   0x7   :  { %v18_v10 = vadd.f32 %v17_v6, %v15_v8  ;;  %p53_p3 = por %p52_p2, %p51_p1 }
   0x9   :  { %p54_p4 = pnand %p53_p3, %p47_p0 }
  0x11   :  { %v45_v7 = vpop.eup %44 }
  0x12   :  { %v22_v9 = vmul.f32 %v45_v7, %v20_v1 }
  0x14   :  { %v23_v11 = vsub.f32 2.0, %v22_v9 }
  0x16   :  { %v24_v12 = vmul.f32 %v45_v7, %v23_v11 }
  0x18   :  { %v26_v13 = vmul.f32 %v24_v12, %v18_v10 }
  0x1a   :  { %v27_v14 = vsel %vm25_vm0, %v26_v13, 0.0 }
  0x1b   :  { %28 = vst [vmem:[#allocation2] sm:$0xff] %v27_v14 }
  0x1c   :  { %57 = shalt.err (!%p54_p4)
}
  0x1d   :  { %38 = dma.vmem_to_hbm [thread:$0]  %s36_s19, 128, %s104_s2, [#allocation3]  }
  0x1e   :  { %66 = dma.done.wait [#allocation3], 128  }
  0x1f   :  { %67 = vsyncadd [#allocation3], 4294967168 }
  0x20   :  { %42 = vsyncpa [#allocation3], 1 }

</bundles_post_ra>
